<compile_context>
chip_gen: v7x
topology: tpu7x:2x2x1
jax: 0.10.0
libtpu: 0.0.40
codegen_flags: <defaults>
</compile_context>

<pallas_src>
import jax
import jax.numpy as jnp
from jax.experimental import pallas as pl
from jax.experimental.pallas import tpu as pltpu

STATE_DIM = 4
ACTION_DIM = 2
IN_DIM = STATE_DIM + ACTION_DIM   # 6
IN_PAD = 8                        # 6 -> 8  (sublane aligned input features)
OUT_PAD = 8                       # 4 -> 8  (sublane aligned output features)
LANE = 128
SUBLANE = 8


def _round_up(x, m):
    return ((x + m - 1) // m) * m


def model_network_kernel(xt_ref, w1t_ref, b1_ref, w2t_ref, b2_ref, o_ref):
    # xt_ref : (IN_PAD, block_b)   transposed input, batch on lanes
    # w1t_ref: (Hp, IN_PAD)        W1^T, zero padded
    # b1_ref : (Hp, 1)             b1 as a column (broadcast along lanes)
    # w2t_ref: (OUT_PAD, Hp)       W2^T, zero padded (rows 4..7 are zero)
    # b2_ref : (OUT_PAD, 1)
    # o_ref  : (OUT_PAD, block_b)  lane-dense output, batch on lanes
    h = jnp.dot(w1t_ref[...], xt_ref[...], preferred_element_type=jnp.float32)
    h = jnp.maximum(h + b1_ref[...], 0.0)                 # (Hp, block_b)
    y = jnp.dot(w2t_ref[...], h, preferred_element_type=jnp.float32)
    o_ref[...] = jnp.tanh(y + b2_ref[...]).astype(o_ref.dtype)


def model_network_forward(state_action, w1, b1, w2, b2, block_b=4096):
    """Pallas-backed equivalent of ModelNetwork.forward.

    w1: (IN_DIM, H), b1: (H,), w2: (H, STATE_DIM), b2: (STATE_DIM,)
    """
    if state_action.ndim < 2:
        state_action = state_action[None, :]              # unsqueeze(0)
    x = state_action.astype(jnp.float32)
    B = x.shape[0]
    H = w1.shape[1]
    Hp = _round_up(H, SUBLANE)

    # Pick the number of grid steps first, then size the block (multiple of
    # 128 lanes) to cover B as tightly as possible -> batch padding stays
    # bounded by ~128 rows per grid step instead of up to a whole block.
    num_blocks = pl.cdiv(B, block_b)
    block_b = _round_up(pl.cdiv(B, num_blocks), LANE)
    Bp = num_blocks * block_b

    # --- Transposed, zero-padded operands (all padding numerically inert). ---
    xt = jnp.zeros((IN_PAD, Bp), jnp.float32).at[:IN_DIM, :B].set(x.T)
    w1t = jnp.zeros((Hp, IN_PAD), jnp.float32).at[:H, :IN_DIM].set(
        w1.astype(jnp.float32).T)
    b1p = jnp.zeros((Hp, 1), jnp.float32).at[:H, 0].set(b1.astype(jnp.float32))
    w2t = jnp.zeros((OUT_PAD, Hp), jnp.float32).at[:STATE_DIM, :H].set(
        w2.astype(jnp.float32).T)
    b2p = jnp.zeros((OUT_PAD, 1), jnp.float32).at[:STATE_DIM, 0].set(
        b2.astype(jnp.float32))

    out_t = pl.pallas_call(
        model_network_kernel,
        out_shape=jax.ShapeDtypeStruct((OUT_PAD, Bp), jnp.float32),
        grid_spec=pltpu.PrefetchScalarGridSpec(
            num_scalar_prefetch=0,
            grid=(num_blocks,),
            in_specs=[
                pl.BlockSpec((IN_PAD, block_b), lambda i: (0, i)),   # x^T, batch-blocked
                pl.BlockSpec((Hp, IN_PAD), lambda i: (0, 0)),        # W1^T (broadcast)
                pl.BlockSpec((Hp, 1), lambda i: (0, 0)),             # b1   (broadcast)
                pl.BlockSpec((OUT_PAD, Hp), lambda i: (0, 0)),       # W2^T (broadcast)
                pl.BlockSpec((OUT_PAD, 1), lambda i: (0, 0)),        # b2   (broadcast)
            ],
            out_specs=pl.BlockSpec((OUT_PAD, block_b), lambda i: (0, i)),
        ),
        compiler_params=pltpu.CompilerParams(
            dimension_semantics=("parallel",),   # independent batch blocks
        ),
    )(xt, w1t, b1p, w2t, b2p)

    # Per-feature scale [2, 3, 0.21, 3] applied on the tiny (B, 4) result;
    # fuses with the transpose + slice (no extra HBM round-trip of padding).
    scale = jnp.array([2.0, 3.0, 0.21, 3.0], dtype=jnp.float32)
    return out_t[:STATE_DIM, :B].T * scale


def init_params(key, num_hidden=128):
    """Deterministic parameter init matching the PyTorch layer shapes.

    PyTorch nn.Linear stores weight as (out, in); we keep (in, out) so the
    reference does x @ W directly (the kernel transposes internally).
    """
    k1, k2, k3, k4 = jax.random.split(key, 4)
    lim1 = 1.0 / jnp.sqrt(IN_DIM)
    lim2 = 1.0 / jnp.sqrt(num_hidden)
    w1 = jax.random.uniform(k1, (IN_DIM, num_hidden), jnp.float32, -lim1, lim1)
    b1 = jax.random.uniform(k2, (num_hidden,), jnp.float32, -lim1, lim1)
    w2 = jax.random.uniform(k3, (num_hidden, STATE_DIM), jnp.float32, -lim2, lim2)
    b2 = jax.random.uniform(k4, (STATE_DIM,), jnp.float32, -lim2, lim2)
    return w1, b1, w2, b2


def reference_forward(state_action, w1, b1, w2, b2):
    """Pure-JAX reference for correctness checking."""
    if state_action.ndim < 2:
        state_action = state_action[None, :]
    h = jnp.maximum(state_action @ w1 + b1, 0.0)
    y = jnp.tanh(h @ w2 + b2)
    scale = jnp.array([2.0, 3.0, 0.21, 3.0], dtype=jnp.float32)
    return y * scale


if __name__ == "__main__":
    key = jax.random.PRNGKey(0)
    pkey, xkey = jax.random.split(key)

    num_hidden = 32   # small hidden size for the example (padded to 32 sublane-aligned)
    batch = 8

    w1, b1, w2, b2 = init_params(pkey, num_hidden=num_hidden)
    state_action = jax.random.normal(xkey, (batch, IN_DIM), dtype=jnp.float32)

    out = jax.block_until_ready(model_network_forward(state_action, w1, b1, w2, b2))
    ref = reference_forward(state_action, w1, b1, w2, b2)
    assert out.shape == (batch, STATE_DIM)
    assert jnp.allclose(out, ref, atol=1e-5, rtol=1e-5)

    # 1-D (unsqueeze) path.
    out1 = jax.block_until_ready(
        model_network_forward(state_action[0], w1, b1, w2, b2))
    assert out1.shape == (1, STATE_DIM)
    assert jnp.allclose(out1, reference_forward(state_action[0], w1, b1, w2, b2),
                        atol=1e-5, rtol=1e-5)

    # Multi-block grid path (non-aligned batch, small block_b -> grid of 3).
    xkey2 = jax.random.fold_in(xkey, 1)
    sa_big = jax.random.normal(xkey2, (300, IN_DIM), dtype=jnp.float32)
    out_big = jax.block_until_ready(
        model_network_forward(sa_big, w1, b1, w2, b2, block_b=128))
    ref_big = reference_forward(sa_big, w1, b1, w2, b2)
    assert out_big.shape == (300, STATE_DIM)
    assert jnp.allclose(out_big, ref_big, atol=1e-5, rtol=1e-5)

    print("KERNEL_OK")
</pallas_src>

<mosaic_0001>
module attributes {stable_mosaic.version = 11 : i64} {
  func.func @model_network_kernel(%arg0: i32, %arg1: memref<8x128xf32, #tpu.memory_space<vmem>>, %arg2: memref<32x8xf32, #tpu.memory_space<vmem>>, %arg3: memref<32x1xf32, #tpu.memory_space<vmem>>, %arg4: memref<8x32xf32, #tpu.memory_space<vmem>>, %arg5: memref<8x1xf32, #tpu.memory_space<vmem>>, %arg6: memref<8x128xf32, #tpu.memory_space<vmem>>) attributes {dimension_semantics = [#tpu.dimension_semantics<parallel>], iteration_bounds = array<i64: 1>, scalar_prefetch = 0 : i64, scratch_operands = 0 : i64, tpu.core_type = #tpu.core_type<tc>, window_params = [{transform_indices = @transform_0, window_bounds = array<i64: 8, 128>}, {pipeline_mode = #tpu.pipeline_mode<synchronous>, transform_indices = @transform_1, window_bounds = array<i64: 32, 8>}, {pipeline_mode = #tpu.pipeline_mode<synchronous>, transform_indices = @transform_2, window_bounds = array<i64: 32, 1>}, {pipeline_mode = #tpu.pipeline_mode<synchronous>, transform_indices = @transform_3, window_bounds = array<i64: 8, 32>}, {pipeline_mode = #tpu.pipeline_mode<synchronous>, transform_indices = @transform_4, window_bounds = array<i64: 8, 1>}, {transform_indices = @transform_5, window_bounds = array<i64: 8, 128>}]} {
    %c0 = arith.constant 0 : index
    %c0_0 = arith.constant 0 : index
    %0 = vector.load %arg2[%c0, %c0_0] : memref<32x8xf32, #tpu.memory_space<vmem>>, vector<32x8xf32>
    %c0_1 = arith.constant 0 : index
    %c0_2 = arith.constant 0 : index
    %1 = vector.load %arg1[%c0_1, %c0_2] : memref<8x128xf32, #tpu.memory_space<vmem>>, vector<8x128xf32>
    %cst = arith.constant dense<0.000000e+00> : vector<32x128xf32>
    %2 = tpu.matmul %0, %1, %cst {dimension_numbers = #tpu.dot_dimension_numbers<[1], [0], [0], [1], [0, 0, 1, 1], [], []>} : vector<32x8xf32>, vector<8x128xf32>, vector<32x128xf32> -> vector<32x128xf32>
    %c0_3 = arith.constant 0 : index
    %c0_4 = arith.constant 0 : index
    %3 = vector.load %arg3[%c0_3, %c0_4] : memref<32x1xf32, #tpu.memory_space<vmem>>, vector<32x1xf32>
    %4 = vector.broadcast %3 : vector<32x1xf32> to vector<32x128xf32>
    %5 = arith.addf %2, %4 : vector<32x128xf32>
    %cst_5 = arith.constant 0.000000e+00 : f32
    %6 = vector.broadcast %cst_5 : f32 to vector<32x128xf32>
    %7 = arith.maximumf %5, %6 : vector<32x128xf32>
    %c0_6 = arith.constant 0 : index
    %c0_7 = arith.constant 0 : index
    %8 = vector.load %arg4[%c0_6, %c0_7] : memref<8x32xf32, #tpu.memory_space<vmem>>, vector<8x32xf32>
    %cst_8 = arith.constant dense<0.000000e+00> : vector<8x128xf32>
    %9 = tpu.matmul %8, %7, %cst_8 {dimension_numbers = #tpu.dot_dimension_numbers<[1], [0], [0], [1], [0, 0, 1, 1], [], []>} : vector<8x32xf32>, vector<32x128xf32>, vector<8x128xf32> -> vector<8x128xf32>
    %c0_9 = arith.constant 0 : index
    %c0_10 = arith.constant 0 : index
    %10 = vector.load %arg5[%c0_9, %c0_10] : memref<8x1xf32, #tpu.memory_space<vmem>>, vector<8x1xf32>
    %11 = vector.broadcast %10 : vector<8x1xf32> to vector<8x128xf32>
    %12 = arith.addf %9, %11 : vector<8x128xf32>
    %13 = math.tanh %12 : vector<8x128xf32>
    %c0_11 = arith.constant 0 : index
    %c0_12 = arith.constant 0 : index
    %14 = vector.load %arg6[%c0_11, %c0_12] : memref<8x128xf32, #tpu.memory_space<vmem>>, vector<8x128xf32>
    tpu.vector_store %arg6[%c0_11, %c0_12], %13 {strides = array<i32>} : memref<8x128xf32, #tpu.memory_space<vmem>>, vector<8x128xf32>,
    return
  }
  func.func @transform_0(%arg0: i32) -> (i32, i32) {
    %c0_i32 = arith.constant 0 : i32
    %c0_i32_0 = arith.constant 0 : i32
    return %c0_i32, %arg0 : i32, i32
  }
  func.func @transform_1(%arg0: i32) -> (i32, i32) {
    %c0_i32 = arith.constant 0 : i32
    %c0_i32_0 = arith.constant 0 : i32
    %c0_i32_1 = arith.constant 0 : i32
    return %c0_i32, %c0_i32_0 : i32, i32
  }
  func.func @transform_2(%arg0: i32) -> (i32, i32) {
    %c0_i32 = arith.constant 0 : i32
    %c0_i32_0 = arith.constant 0 : i32
    %c0_i32_1 = arith.constant 0 : i32
    return %c0_i32, %c0_i32_0 : i32, i32
  }
  func.func @transform_3(%arg0: i32) -> (i32, i32) {
    %c0_i32 = arith.constant 0 : i32
    %c0_i32_0 = arith.constant 0 : i32
    %c0_i32_1 = arith.constant 0 : i32
    return %c0_i32, %c0_i32_0 : i32, i32
  }
  func.func @transform_4(%arg0: i32) -> (i32, i32) {
    %c0_i32 = arith.constant 0 : i32
    %c0_i32_0 = arith.constant 0 : i32
    %c0_i32_1 = arith.constant 0 : i32
    return %c0_i32, %c0_i32_0 : i32, i32
  }
  func.func @transform_5(%arg0: i32) -> (i32, i32) {
    %c0_i32 = arith.constant 0 : i32
    %c0_i32_0 = arith.constant 0 : i32
    return %c0_i32, %arg0 : i32, i32
  }
}

</mosaic_0001>

<bundles_post_ra>
// kernel: tpu_custom_call.1
= control target key start
LH: loop header
LB: loop body
LE: loop exit
PB: predicated region body
PF: predicated region fallthrough
CT: control target
= control target key end

     0   :  { %vm50_vm0 = vcmask 64512   ;;  %v322_v5 = vmov 0   ;;  %s406_s0 = inlined_call_operand.vmem [shape: f32[8,128], index: 0, kind: input, shape index: {}]   ;;  %s407_s1 = inlined_call_operand.vmem [shape: f32[32,8], index: 1, kind: input, shape index: {}]   ;;  %s408_s2 = inlined_call_operand.vmem [shape: f32[32,1], index: 2, kind: input, shape index: {}]   ;;  %s409_s3 = inlined_call_operand.vmem [shape: f32[8,32], index: 3, kind: input, shape index: {}]   ;;  %s410_s4 = inlined_call_operand.vmem [shape: f32[8,1], index: 4, kind: input, shape index: {}]   ;;  %s411_s5 = inlined_call_operand.hbm [shape: f32[8,128], index: 5, kind: output, shape index: {}]  }
   0x1   :  { %v25_v0 = vld [vmem:[%s406_s0] sm:$0xff]  ;;  %v22_v2 = vld [vmem:[%s407_s1 + $0x8] sm:$0xff]  ;;  %v23_v3 = vld [vmem:[%s407_s1 + $0x10] sm:$0xff]  ;;  %294 = vset.pattern.permute.xlu0 %v322_v5 }
   0x2   :  { %v21_v1 = vld [vmem:[%s407_s1] sm:$0xff]  ;;  %264 = vmatprep.subr.mxu0 %v25_v0  ;;  %v28_v6 = vld [vmem:[%s408_s2 + $0x10] sm:$0xff] }
   0x3   :  { %266 = vmatprep.mubr.msk.f32.mxu0 %vm50_vm0, %v21_v1  ;;  %v26_v4 = vld [vmem:[%s408_s2] sm:$0xff]  ;;  %265 = vmatpush3.msra.mxu0 %v25_v0 }
   0x4   :  { %267 = vmatmul.mubr.msk.f32.vlgmr.msra.gmra.mrb[0].mxu0 %vm50_vm0, %v22_v2  ;;  %32 = vperm.xlu0 %294, %v26_v4  }
   0x5   :  { %10 = vsyncpa [#allocation3], 0  ;;  %269 = vmatprep.mubr.msk.f32.mxu0 %vm50_vm0, %v23_v3  ;;  %v24_v7 = vld [vmem:[%s407_s1 + $0x18] sm:$0xff]  ;;  %v27_v8 = vld [vmem:[%s408_s2 + $0x8] sm:$0xff]  ;;  %295 = vset.pattern.permute.xlu1 %v322_v5  ;;  %v323_v11 = vmov 0.0|0.0   ;;  %vm324_vm1 = vmmov 0  }
   0x6   :  { %42 = vperm.xlu1 %295, %v28_v6   ;;  %v29_v9 = vld [vmem:[%s408_s2 + $0x18] sm:$0xff]  ;;  %v153_v10 = vld [vmem:[%s410_s4] sm:$0xff]  ;;  %283 = vmatprep.subr.bf16.mxu1 %v323_v11  ;;  %v325_v12 = vmov 0.0   ;;  %vm159_vm2 = vcmask 261120   ;;  %s326_s4 = smov [#allocation2]  }
   0x7   :  { %280 = vmatprep.mubr.msk.f32.mxu1 %vm324_vm1, %v325_v12  ;;  %v152_v31 = vld [vmem:[%s409_s3] sm:$0xff]  ;;  %s241_s12 = sshll.u32 %s326_s4, 4  ;;  %s242_s12 = int_to_ptr.vmem [resolvable:$true] %s241_s12 }
   0x8   :  { %270 = vmatmul.mubr.msk.f32.gmra.mrb[2].mxu0 %vm50_vm0, %v24_v7  ;;  %37 = vperm.xlu0 %294, %v27_v8   ;;  %s298_s13 = scalar_lea.vmem %s242_s12, 128  ;;  %p303_p1 = scmp.lt.s32.totalorder %s242_s12, %s242_s12 }
   0x9   :  { %p299_p0 = scmp.ne.s32.totalorder %s242_s12, %s298_s13  ;;  %p304_p2 = scmp.lt.s32.totalorder %s298_s13, %s298_s13 }
   0xa   :  { %47 = vperm.xlu1 %295, %v29_v9  }
   0xb   :  { %p305_p3 = por %p304_p2, %p303_p1 }
   0xc   :  { %156 = vperm.xlu0 %294, %v153_v10  }
   0xd   :  { %p306_p4 = pnand %p305_p3, %p299_p0 }
  0x83   :  { %v33_v13 = vpop.permute.xlu0 %32 }
  0x85   :  { %v43_v14 = vpop.permute.xlu1 %42 }
  0x87   :  { %v38_v15 = vpop.permute.xlu0 %37 }
  0x89   :  { %v48_v21 = vpop.permute.xlu1 %47 }
  0x8b   :  { %v157_v32 = vpop.permute.xlu0 %156 }
  0xd7   :  { %v268_v16 = vpop.f32.mrb[0].mxu0 }
  0xd8   :  { %v135_v17 = vadd.f32 %v268_v16, %v38_v15  ;;  %v129_v18 = vpop.f32.mrb[1].mxu0 }
  0xd9   :  { %v130_v19 = vadd.f32 %v129_v18, %v33_v13 }
  0xda   :  { %v149_v20 = vmax.f32 %v135_v17, 0.0 }
  0xdb   :  { %v148_v22 = vmax.f32 %v130_v19, 0.0  ;;  %v271_v23 = vpop.f32.mrb[2].mxu0 }
  0xdc   :  { %v145_v24 = vadd.f32 %v271_v23, %v48_v21  ;;  %v139_v25 = vpop.f32.mrb[3].mxu0 }
  0xdd   :  { %v140_v26 = vadd.f32 %v139_v25, %v43_v14  ;;  %v284_v27 = vpack.c.bf16 %v149_v20, %v148_v22 }
  0xde   :  { %v151_v28 = vmax.f32 %v145_v24, 0.0 }
  0xdf   :  { %v150_v29 = vmax.f32 %v140_v26, 0.0  ;;  %285 = vmatpush3.bf16.msra.mxu1 %v284_v27 }
  0xe0   :  { %286 = vmatprep.subr.bf16.mxu1 %v323_v11 }
  0xe1   :  { %v287_v30 = vpack.c.bf16 %v151_v28, %v150_v29 }
  0xe3   :  { %288 = vmatpush3.bf16.msra.mxu1 %v287_v30 }
  0xe6   :  { %281 = vmatmul.mubr.msk.f32.vlgmr.msra.gmra.mrb[0].mxu1 %vm159_vm2, %v152_v31 }
 0x1b9   :  { %v229_v33 = vpop.f32.mrb[0].mxu1 }
 0x1ba   :  { %v230_v34 = vadd.f32 %v229_v33, %v157_v32  ;;  %v282_v35 = vpop.f32.mrb[1].mxu1 }
 0x1bc   :  { %296 = vtanh.f32 %v230_v34 }
 0x1c6   :  { %v297_v36 = vpop.eup %296 }
 0x1c7   :  { %234 = vst [vmem:[#allocation2] sm:$0xff] %v297_v36 }
 0x1c8   :  { %309 = shalt.err (!%p306_p4)
}
 0x1c9   :  { %s310_s15 = scalar_lea.hbm %s411_s5, 128 }
 0x1ca   :  { %p311_p5 = scmp.ne.s32.totalorder %s411_s5, %s310_s15  ;;  %p314_p6 = scmp.lt.u32.totalorder %s310_s15, %s411_s5 }
 0x1cc   :  { %p316_p7 = pnand %p314_p6, %p311_p5 }
 0x1ce   :  { %319 = shalt.err (!%p316_p7)
}
 0x1cf   :  { %244 = dma.vmem_to_hbm [thread:$0]  %s242_s12, 128, %s411_s5, [#allocation3]  }
 0x1d0   :  { %320 = dma.done.wait [#allocation3], 128  }
 0x1d1   :  { %321 = vsyncadd [#allocation3], 4294967168 }
 0x1d2   :  { %248 = vsyncpa [#allocation3], 1 }

</bundles_post_ra>
